<compile_context>
chip_gen: v7x
topology: tpu7x:2x2x1
jax: 0.10.0
libtpu: 0.0.40
codegen_flags: <defaults>
</compile_context>

<pallas_src>
import functools

import jax
import jax.numpy as jnp
from jax.experimental import pallas as pl
from jax.experimental.pallas import tpu as pltpu


def _softplus(x):
    # matches torch.nn.Softplus(beta=1, threshold=20)
    return jnp.where(x > 20.0, x, jnp.log1p(jnp.exp(jnp.minimum(x, 20.0))))


def _round_up(v, m):
    return (v + m - 1) // m * m


def gnn_base_kernel(x_ref, w_emb_ref, b_emb_ref, w1_ref, b1_ref,
                    w2_ref, b2_ref, out_ref, acc_ref, *, num_nodes, tile_rows):
    i = pl.program_id(0)

    @pl.when(i == 0)
    def _init():
        acc_ref[...] = jnp.zeros_like(acc_ref)

    # Mask rows beyond the true node count (last tile may extend past N).
    row_ids = jax.lax.broadcasted_iota(jnp.int32, (tile_rows, 1), 0) + i * tile_rows
    xt = jnp.where(row_ids < num_nodes, x_ref[...].astype(jnp.float32), 0.0)
    acc_ref[...] += jnp.sum(xt, axis=0, keepdims=True)

    @pl.when(i == pl.num_programs(0) - 1)
    def _finalize():
        # mean-pool commuted with the affine node embedding.
        g_x = acc_ref[...] * (1.0 / num_nodes)                                  # [1, F]
        g = jnp.dot(g_x, w_emb_ref[...],
                    preferred_element_type=jnp.float32) + b_emb_ref[...]        # [1, H]
        z1 = jnp.dot(g, w1_ref[...],
                     preferred_element_type=jnp.float32) + b1_ref[...]          # [1, H]
        a1 = _softplus(z1)
        y = jnp.dot(a1, w2_ref[...],
                    preferred_element_type=jnp.float32) + b2_ref[...]           # [1, O_pad]
        out_ref[...] = y.astype(out_ref.dtype)


def gnn_base_forward(x, params, *, tile_rows=512):
    w_emb, b_emb, w1, b1, w2, b2 = params
    num_nodes, feat = x.shape
    hidden = w_emb.shape[1]
    output_dim = w2.shape[1]

    # Lane-dense output: pad the final Linear to a multiple of 128 lanes.
    out_pad = _round_up(output_dim, 128)
    if out_pad != output_dim:
        w2 = jnp.pad(w2, ((0, 0), (0, out_pad - output_dim)))
        b2 = jnp.pad(b2, ((0, 0), (0, out_pad - output_dim)))

    # Node tile: multiple of 8 sublanes, capped so double-buffering stays well
    # inside v7x's 64 MiB physical VMEM while still amortizing per-step cost.
    tile_rows = max(8, min(_round_up(tile_rows, 8), _round_up(num_nodes, 8)))
    grid = (pl.cdiv(num_nodes, tile_rows),)

    const = lambda shape: pl.BlockSpec(shape, lambda i: tuple(0 for _ in shape))
    in_specs = [
        pl.BlockSpec((tile_rows, feat), lambda i: (i, 0)),   # streamed node tiles
        const(w_emb.shape), const(b_emb.shape),              # weights stay resident
        const(w1.shape), const(b1.shape),
        const(w2.shape), const(b2.shape),
    ]
    out_specs = pl.BlockSpec((1, out_pad), lambda i: (0, 0))

    # Explicit VMEM budget (v7x default scoped limit is smaller than v5e/v6e).
    x_tile_bytes = tile_rows * feat * x.dtype.itemsize
    w_bytes = sum(int(a.size) * a.dtype.itemsize for a in (w_emb, b_emb, w1, b1, w2, b2))
    vmem_limit = int(min(128 * 1024 * 1024,
                         max(16 * 1024 * 1024,
                             4 * x_tile_bytes + 2 * w_bytes + 4 * 1024 * 1024)))

    cost = pl.CostEstimate(
        flops=int(2 * num_nodes * feat + 2 * feat * hidden
                  + 2 * hidden * hidden + 2 * hidden * out_pad),
        transcendentals=int(hidden),
        bytes_accessed=int(x.size * x.dtype.itemsize + w_bytes + out_pad * 4),
    )

    y = pl.pallas_call(
        functools.partial(gnn_base_kernel, num_nodes=num_nodes, tile_rows=tile_rows),
        out_shape=jax.ShapeDtypeStruct((1, out_pad), jnp.float32),
        grid=grid,
        in_specs=in_specs,
        out_specs=out_specs,
        scratch_shapes=[pltpu.VMEM((1, feat), jnp.float32)],
        compiler_params=pltpu.CompilerParams(
            dimension_semantics=("arbitrary",),   # node axis is a reduction
            vmem_limit_bytes=vmem_limit,
        ),
        cost_estimate=cost,
    )(x, w_emb, b_emb, w1, b1, w2, b2)

    return y[:, :output_dim]


def reference_forward(x, params):
    w_emb, b_emb, w1, b1, w2, b2 = params
    h = x @ w_emb + b_emb
    g = jnp.mean(h, axis=0, keepdims=True)
    z1 = g @ w1 + b1
    a1 = jnp.where(z1 > 20.0, z1, jnp.log1p(jnp.exp(jnp.minimum(z1, 20.0))))
    return a1 @ w2 + b2


def init_params(key, node_input_dim, hidden_dim, output_dim):
    ks = jax.random.split(key, 6)
    scale = 0.1
    w_emb = scale * jax.random.normal(ks[0], (node_input_dim, hidden_dim), jnp.float32)
    b_emb = scale * jax.random.normal(ks[1], (1, hidden_dim), jnp.float32)
    w1 = scale * jax.random.normal(ks[2], (hidden_dim, hidden_dim), jnp.float32)
    b1 = scale * jax.random.normal(ks[3], (1, hidden_dim), jnp.float32)
    w2 = scale * jax.random.normal(ks[4], (hidden_dim, output_dim), jnp.float32)
    b2 = scale * jax.random.normal(ks[5], (1, output_dim), jnp.float32)
    return (w_emb, b_emb, w1, b1, w2, b2)


if __name__ == "__main__":
    node_input_dim = 8
    edge_input_dim = 4   # unused by base forward (edge convs live in subclasses)
    hidden_dim = 32
    output_dim = 4
    num_nodes = 16

    key = jax.random.PRNGKey(0)
    kx, kp = jax.random.split(key)
    x = jax.random.normal(kx, (num_nodes, node_input_dim), jnp.float32)
    params = init_params(kp, node_input_dim, hidden_dim, output_dim)

    # tile_rows=8 -> 2 grid steps, exercising the init/accumulate/finalize path.
    out = gnn_base_forward(x, params, tile_rows=8)
    out = jax.block_until_ready(out)

    ref = reference_forward(x, params)
    assert out.shape == (1, output_dim)
    assert jnp.allclose(out, ref, atol=1e-5, rtol=1e-5), (out, ref)

    print("KERNEL_OK")
</pallas_src>

<mosaic_0001>
module attributes {stable_mosaic.version = 11 : i64} {
  func.func @gnn_base_kernel(%arg0: i32, %arg1: memref<8x8xf32, #tpu.memory_space<vmem>>, %arg2: memref<8x32xf32, #tpu.memory_space<vmem>>, %arg3: memref<1x32xf32, #tpu.memory_space<vmem>>, %arg4: memref<32x32xf32, #tpu.memory_space<vmem>>, %arg5: memref<1x32xf32, #tpu.memory_space<vmem>>, %arg6: memref<32x128xf32, #tpu.memory_space<vmem>>, %arg7: memref<1x128xf32, #tpu.memory_space<vmem>>, %arg8: memref<1x128xf32, #tpu.memory_space<vmem>>, %arg9: memref<1x8xf32, #tpu.memory_space<vmem>>) attributes {dimension_semantics = [#tpu.dimension_semantics<arbitrary>], iteration_bounds = array<i64: 2>, scalar_prefetch = 0 : i64, scratch_operands = 1 : i64, tpu.core_type = #tpu.core_type<tc>, window_params = [{transform_indices = @transform_0, window_bounds = array<i64: 8, 8>}, {pipeline_mode = #tpu.pipeline_mode<synchronous>, transform_indices = @transform_1, window_bounds = array<i64: 8, 32>}, {pipeline_mode = #tpu.pipeline_mode<synchronous>, transform_indices = @transform_2, window_bounds = array<i64: 1, 32>}, {pipeline_mode = #tpu.pipeline_mode<synchronous>, transform_indices = @transform_3, window_bounds = array<i64: 32, 32>}, {pipeline_mode = #tpu.pipeline_mode<synchronous>, transform_indices = @transform_4, window_bounds = array<i64: 1, 32>}, {pipeline_mode = #tpu.pipeline_mode<synchronous>, transform_indices = @transform_5, window_bounds = array<i64: 32, 128>}, {pipeline_mode = #tpu.pipeline_mode<synchronous>, transform_indices = @transform_6, window_bounds = array<i64: 1, 128>}, {pipeline_mode = #tpu.pipeline_mode<synchronous>, transform_indices = @transform_7, window_bounds = array<i64: 1, 128>}]} {
    %c0_i32 = arith.constant 0 : i32
    %0 = arith.cmpi eq, %arg0, %c0_i32 : i32
    %1 = arith.extui %0 : i1 to i32
    %c0_i32_0 = arith.constant 0 : i32
    %2 = arith.cmpi ne, %1, %c0_i32_0 : i32
    scf.if %2 {
      %cst_8 = arith.constant 0.000000e+00 : f32
      %22 = vector.broadcast %cst_8 : f32 to vector<1x8xf32>
      %c0_9 = arith.constant 0 : index
      %c0_10 = arith.constant 0 : index
      %23 = vector.load %arg9[%c0_9, %c0_10] : memref<1x8xf32, #tpu.memory_space<vmem>>, vector<1x8xf32>
      tpu.vector_store %arg9[%c0_9, %c0_10], %22 {strides = array<i32>} : memref<1x8xf32, #tpu.memory_space<vmem>>, vector<1x8xf32>,
    } else {
    }
    %3 = tpu.iota {dimensions = array<i32: 0>} : vector<8x1xi32>
    %c8_i32 = arith.constant 8 : i32
    %4 = arith.muli %arg0, %c8_i32 : i32
    %5 = vector.broadcast %4 : i32 to vector<8x1xi32>
    %6 = arith.addi %3, %5 : vector<8x1xi32>
    %c16_i32 = arith.constant 16 : i32
    %7 = vector.broadcast %c16_i32 : i32 to vector<8x1xi32>
    %8 = arith.cmpi slt, %6, %7 : vector<8x1xi32>
    %c0 = arith.constant 0 : index
    %c0_1 = arith.constant 0 : index
    %9 = vector.load %arg1[%c0, %c0_1] : memref<8x8xf32, #tpu.memory_space<vmem>>, vector<8x8xf32>
    %cst = arith.constant 0.000000e+00 : f32
    %10 = vector.shape_cast %8 : vector<8x1xi1> to vector<8x1xi1>
    %11 = vector.broadcast %10 : vector<8x1xi1> to vector<8x8xi1>
    %12 = vector.broadcast %cst : f32 to vector<8x8xf32>
    %13 = arith.select %11, %9, %12 : vector<8x8xi1>, vector<8x8xf32>
    %c0_2 = arith.constant 0 : index
    %c0_3 = arith.constant 0 : index
    %14 = vector.load %arg9[%c0_2, %c0_3] : memref<1x8xf32, #tpu.memory_space<vmem>>, vector<1x8xf32>
    %cst_4 = arith.constant dense<0.000000e+00> : vector<8xf32>
    %15 = vector.multi_reduction <add>, %13, %cst_4 [0] : vector<8x8xf32> to vector<8xf32>
    %16 = vector.shape_cast %15 : vector<8xf32> to vector<1x8xf32>
    %17 = arith.addf %14, %16 : vector<1x8xf32>
    %c0_5 = arith.constant 0 : index
    %c0_6 = arith.constant 0 : index
    %18 = vector.load %arg9[%c0_5, %c0_6] : memref<1x8xf32, #tpu.memory_space<vmem>>, vector<1x8xf32>
    tpu.vector_store %arg9[%c0_5, %c0_6], %17 {strides = array<i32>} : memref<1x8xf32, #tpu.memory_space<vmem>>, vector<1x8xf32>,
    %c1_i32 = arith.constant 1 : i32
    %19 = arith.cmpi eq, %arg0, %c1_i32 : i32
    %20 = arith.extui %19 : i1 to i32
    %c0_i32_7 = arith.constant 0 : i32
    %21 = arith.cmpi ne, %20, %c0_i32_7 : i32
    scf.if %21 {
      %c0_8 = arith.constant 0 : index
      %c0_9 = arith.constant 0 : index
      %22 = vector.load %arg9[%c0_8, %c0_9] : memref<1x8xf32, #tpu.memory_space<vmem>>, vector<1x8xf32>
      %cst_10 = arith.constant 6.250000e-02 : f32
      %23 = vector.broadcast %cst_10 : f32 to vector<1x8xf32>
      %24 = arith.mulf %22, %23 : vector<1x8xf32>
      %c0_11 = arith.constant 0 : index
      %c0_12 = arith.constant 0 : index
      %25 = vector.load %arg2[%c0_11, %c0_12] : memref<8x32xf32, #tpu.memory_space<vmem>>, vector<8x32xf32>
      %cst_13 = arith.constant dense<0.000000e+00> : vector<1x32xf32>
      %26 = tpu.matmul %24, %25, %cst_13 {dimension_numbers = #tpu.dot_dimension_numbers<[1], [0], [0], [1], [0, 0, 1, 1], [], []>} : vector<1x8xf32>, vector<8x32xf32>, vector<1x32xf32> -> vector<1x32xf32>
      %c0_14 = arith.constant 0 : index
      %c0_15 = arith.constant 0 : index
      %27 = vector.load %arg3[%c0_14, %c0_15] : memref<1x32xf32, #tpu.memory_space<vmem>>, vector<1x32xf32>
      %28 = arith.addf %26, %27 : vector<1x32xf32>
      %c0_16 = arith.constant 0 : index
      %c0_17 = arith.constant 0 : index
      %29 = vector.load %arg4[%c0_16, %c0_17] : memref<32x32xf32, #tpu.memory_space<vmem>>, vector<32x32xf32>
      %cst_18 = arith.constant dense<0.000000e+00> : vector<1x32xf32>
      %30 = tpu.matmul %28, %29, %cst_18 {dimension_numbers = #tpu.dot_dimension_numbers<[1], [0], [0], [1], [0, 0, 1, 1], [], []>} : vector<1x32xf32>, vector<32x32xf32>, vector<1x32xf32> -> vector<1x32xf32>
      %c0_19 = arith.constant 0 : index
      %c0_20 = arith.constant 0 : index
      %31 = vector.load %arg5[%c0_19, %c0_20] : memref<1x32xf32, #tpu.memory_space<vmem>>, vector<1x32xf32>
      %32 = arith.addf %30, %31 : vector<1x32xf32>
      %cst_21 = arith.constant 2.000000e+01 : f32
      %33 = vector.broadcast %cst_21 : f32 to vector<1x32xf32>
      %34 = arith.cmpf ogt, %32, %33 : vector<1x32xf32>
      %cst_22 = arith.constant 2.000000e+01 : f32
      %35 = vector.broadcast %cst_22 : f32 to vector<1x32xf32>
      %36 = arith.minimumf %32, %35 : vector<1x32xf32>
      %37 = math.exp %36 : vector<1x32xf32>
      %38 = math.log1p %37 : vector<1x32xf32>
      %39 = arith.select %34, %32, %38 : vector<1x32xi1>, vector<1x32xf32>
      %c0_23 = arith.constant 0 : index
      %c0_24 = arith.constant 0 : index
      %40 = vector.load %arg6[%c0_23, %c0_24] : memref<32x128xf32, #tpu.memory_space<vmem>>, vector<32x128xf32>
      %cst_25 = arith.constant dense<0.000000e+00> : vector<1x128xf32>
      %41 = tpu.matmul %39, %40, %cst_25 {dimension_numbers = #tpu.dot_dimension_numbers<[1], [0], [0], [1], [0, 0, 1, 1], [], []>} : vector<1x32xf32>, vector<32x128xf32>, vector<1x128xf32> -> vector<1x128xf32>
      %c0_26 = arith.constant 0 : index
      %c0_27 = arith.constant 0 : index
      %42 = vector.load %arg7[%c0_26, %c0_27] : memref<1x128xf32, #tpu.memory_space<vmem>>, vector<1x128xf32>
      %43 = arith.addf %41, %42 : vector<1x128xf32>
      %c0_28 = arith.constant 0 : index
      %c0_29 = arith.constant 0 : index
      %44 = vector.load %arg8[%c0_28, %c0_29] : memref<1x128xf32, #tpu.memory_space<vmem>>, vector<1x128xf32>
      tpu.vector_store %arg8[%c0_28, %c0_29], %43 {strides = array<i32>} : memref<1x128xf32, #tpu.memory_space<vmem>>, vector<1x128xf32>,
    } else {
    }
    return
  }
  func.func @transform_0(%arg0: i32) -> (i32, i32) {
    %c0_i32 = arith.constant 0 : i32
    %c0_i32_0 = arith.constant 0 : i32
    return %arg0, %c0_i32 : i32, i32
  }
  func.func @transform_1(%arg0: i32) -> (i32, i32) {
    %c0_i32 = arith.constant 0 : i32
    %c0_i32_0 = arith.constant 0 : i32
    %c0_i32_1 = arith.constant 0 : i32
    return %c0_i32, %c0_i32_0 : i32, i32
  }
  func.func @transform_2(%arg0: i32) -> (i32, i32) {
    %c0_i32 = arith.constant 0 : i32
    %c0_i32_0 = arith.constant 0 : i32
    %c0_i32_1 = arith.constant 0 : i32
    return %c0_i32, %c0_i32_0 : i32, i32
  }
  func.func @transform_3(%arg0: i32) -> (i32, i32) {
    %c0_i32 = arith.constant 0 : i32
    %c0_i32_0 = arith.constant 0 : i32
    %c0_i32_1 = arith.constant 0 : i32
    return %c0_i32, %c0_i32_0 : i32, i32
  }
  func.func @transform_4(%arg0: i32) -> (i32, i32) {
    %c0_i32 = arith.constant 0 : i32
    %c0_i32_0 = arith.constant 0 : i32
    %c0_i32_1 = arith.constant 0 : i32
    return %c0_i32, %c0_i32_0 : i32, i32
  }
  func.func @transform_5(%arg0: i32) -> (i32, i32) {
    %c0_i32 = arith.constant 0 : i32
    %c0_i32_0 = arith.constant 0 : i32
    %c0_i32_1 = arith.constant 0 : i32
    return %c0_i32, %c0_i32_0 : i32, i32
  }
  func.func @transform_6(%arg0: i32) -> (i32, i32) {
    %c0_i32 = arith.constant 0 : i32
    %c0_i32_0 = arith.constant 0 : i32
    %c0_i32_1 = arith.constant 0 : i32
    return %c0_i32, %c0_i32_0 : i32, i32
  }
  func.func @transform_7(%arg0: i32) -> (i32, i32) {
    %c0_i32 = arith.constant 0 : i32
    %c0_i32_0 = arith.constant 0 : i32
    %c0_i32_1 = arith.constant 0 : i32
    return %c0_i32, %c0_i32_0 : i32, i32
  }
}

</mosaic_0001>

<bundles_post_ra>
// kernel: tpu_custom_call.1
= control target key start
LH: loop header
LB: loop body
LE: loop exit
PB: predicated region body
PF: predicated region fallthrough
CT: control target
= control target key end

     0   :  { %12 = vsyncpa [#allocation4], 0  ;;  %s1049_s0 = inlined_call_operand.vmem [shape: f32[16,8], index: 0, kind: input, shape index: {}]   ;;  %s1050_s1 = inlined_call_operand.hbm [shape: f32[8,32], index: 1, kind: input, shape index: {}]   ;;  %s1051_s2 = inlined_call_operand.vmem [shape: f32[1,32], index: 2, kind: input, shape index: {}]   ;;  %s1052_s3 = inlined_call_operand.vmem [shape: f32[32,32], index: 3, kind: input, shape index: {}]   ;;  %s1053_s4 = inlined_call_operand.vmem [shape: f32[1,32], index: 4, kind: input, shape index: {}]   ;;  %s1054_s5 = inlined_call_operand.hbm [shape: f32[32,128], index: 5, kind: input, shape index: {}]   ;;  %s1055_s6 = inlined_call_operand.vmem [shape: f32[1,128], index: 6, kind: input, shape index: {}]   ;;  %s1056_s7 = inlined_call_operand.hbm [shape: f32[1,128], index: 7, kind: output, shape index: {}]  }
   0x1   :  { %13 = vsyncpa [#allocation7], 0 }
   0x2   :  { %14 = vsyncpa [#allocation5], 0  ;;  %s906_s24 = smov 0  }
   0x3 LB: > { %s912_s25 = sadd.s32 4294967295, %s855_s24   ;;  %p640_p0 = scmp.ge.s32.totalorder %s855_s24, 1  ;;  %s855_s24 = sphi %s906_s24, %s20_s24  }
   0x4   : > { %p198_p1 = scmp.lt.s32.totalorder %s855_s24, 3  ;;  %p1057_p3 = scmp.eq.s32.totalorder %s912_s25, 0 }
   0x5   : > { %s857_s26 = smov [#allocation3]   ;;  %s858_s29 = smov [#allocation6]  }
   0x6   : > { %s211_s27 = sshll.u32 %s857_s26, 4  ;;  %p918_p4 = pnand %p640_p0, %p198_p1  ;;  %s212_s27 = int_to_ptr.vmem [resolvable:$true] %s211_s27 }
   0x7   : > { %s230_s30 = sshll.u32 %s858_s29, 4  ;;  %s755_s11 = scalar_lea.hbm %s1050_s1, 128  ;;  %s930_s30 = int_to_ptr.vmem [resolvable:$true] %s230_s30 }
   0x8   : > { %s1059_s28 = scalar_select %p918_p4, 1, 0 }
   0x9   : > { %p721_p5 = pneg %p918_p4  ;;  %p756_p7 = scmp.ne.s32.totalorder %s1050_s1, %s755_s11 }
   0xa   : > { %p762_p11 = scmp.lt.u32.totalorder %s755_s11, %s1050_s1 }
   0xb   : > { %p926_p6 = pnand %p1057_p3, %p721_p5 }
   0xd   : > { %p757_p8 = pneg %p926_p6 }
   0xf   : > { %p758_p9 = pnand %p757_p8, %p756_p7 }
  0x11   : > { %p759_p10 = pneg %p758_p9 }
  0x13   : > { %p764_p12 = pnand %p762_p11, %p759_p10 }
  0x15   : > { %767 = shalt.err (!%p764_p12)
}
  0x16   : > { %s768_s16 = scalar_lea.vmem %s212_s27, 128  ;;  %p776_p5 = scmp.lt.s32.totalorder %s212_s27, %s212_s27 }
  0x17   : > { %p769_p13 = scmp.ne.s32.totalorder %s212_s27, %s768_s16  ;;  %p777_p2 = scmp.lt.s32.totalorder %s768_s16, %s768_s16 }
  0x19   : > { %p771_p0 = pnand %p769_p13, %p757_p8  ;;  %p778_p3 = por %p777_p2, %p776_p5 }
  0x1b   : > { %p772_p1 = pneg %p771_p0 }
  0x1d   : > { %p779_p4 = pnand %p778_p3, %p772_p1 }
  0x1f   : > { %782 = shalt.err (!%p779_p4)
}
  0x20   : > { %724 = dma.hbm_to_vmem [thread:$0]  (!%p926_p6), %s1050_s1, 128, %s212_s27, [#allocation4]  }
  0x21   : > { %s783_s21 = scalar_lea.hbm %s1054_s5, 512 }
  0x22   : > { %p784_p7 = scmp.ne.s32.totalorder %s1054_s5, %s783_s21  ;;  %p790_p4 = scmp.lt.u32.totalorder %s783_s21, %s1054_s5 }
  0x24   : > { %p786_p2 = pnand %p784_p7, %p757_p8 }
  0x26   : > { %p787_p3 = pneg %p786_p2 }
  0x28   : > { %p792_p9 = pnand %p790_p4, %p787_p3 }
  0x2a   : > { %795 = shalt.err (!%p792_p9)
}
  0x2b   : > { %s796_s27 = scalar_lea.vmem %s930_s30, 512  ;;  %p804_p13 = scmp.lt.s32.totalorder %s930_s30, %s930_s30 }
  0x2c   : > { %p797_p10 = scmp.ne.s32.totalorder %s930_s30, %s796_s27  ;;  %p805_p0 = scmp.lt.s32.totalorder %s796_s27, %s796_s27 }
  0x2e   : > { %p799_p11 = pnand %p797_p10, %p757_p8  ;;  %p806_p1 = por %p805_p0, %p804_p13 }
  0x30   : > { %p800_p12 = pneg %p799_p11 }
  0x32   : > { %p807_p5 = pnand %p806_p1, %p800_p12 }
  0x34   : > { %810 = shalt.err (!%p807_p5)
}
  0x35   : > { %s859_s9 = smov 128   ;;  %s860_s10 = smov 8  }
  0x36   : > { %727 = dma.hbm_to_vmem [thread:$0]  (!%p926_p6), %s1054_s5, 512, %s930_s30, [#allocation7], %s859_s9, %s859_s9, %s860_s10  }
  0x37   : > { %p1061_p7 = scmp.ne.s32.totalorder %s1059_s28, 0 }
  0x38   : > { %p1062_p8 = scmp.eq.s32.totalorder (!%p1061_p7), %s912_s25, 0 }
  0x39   : > { %256 = sbr.rel (%p1061_p7) target bundleno = 812 (0x32c), region = 48 }
  0x40   : > { %842 = dma.done.wait (%p1062_p8), [#allocation4], 128   ;;  %p1063_p2 = pmov %p1062_p8 }
  0x42   : > { %844 = vsyncadd (%p1063_p2), [#allocation4], 4294967168  ;;  %p1064_p3 = pmov %p1063_p2 }
  0x43   : > { %p1065_p4 = pmov %p1063_p2 }
  0x44   : > { %846 = dma.done.wait (%p1064_p3), [#allocation7], 512  }
  0x45   : > { %848 = vsyncadd (%p1065_p4), [#allocation7], 4294966784  ;;  %p286_p9 = scmp.lt.s32.totalorder %s912_s25, 1  ;;  %p1066_p6 = scmp.ne.s32.totalorder %s912_s25, 0 }
  0x46   : > { %vm294_vm0 = vcmask (!%p1066_p6), 57344   ;;  %v861_v0 = vmov (!%p1066_p6), 0.0  }
  0x47   : > { %s287_s8 = scalar_select %p286_p9, %s912_s25, 1 }
  0x48   : > { %293 = sbr.rel (%p1066_p6) target bundleno = 79 (0x4f), region = 60  ;;  %295 = vst.msk [vmem:[#allocation2] sm:$0x1] (!%p1066_p6), %vm294_vm0, %v861_v0 }
  0x49   : > { %s647_s30 = sshll.u32 %s287_s8, 3 }
  0x4a   : > { %s289_s14 = scalar_lea.vmem %s1049_s0, %s647_s30 }
  0x4f PF: > { %v296_v1 = vlaneseq  ;;  %s649_s15 = sshll.u32 %s912_s25, 3  ;;  %v302_v5 = vld [vmem:[%s289_s14] sm:$0xff]  ;;  %vm307_vm1 = vcmask 64512   ;;  %vm316_vm3 = vcmask 57344   ;;  %p650_p10 = scmp.ne.s32.totalorder %s912_s25, 1 }
  0x50   : > { %v299_v2 = vstv %s649_s15  ;;  %v306_v13 = vld [vmem:[#allocation2] sm:$0x1]  ;;  %v324_v16 = vld [vmem:[#allocation3] sm:$0xff] (!%p650_p10)  ;;  %v862_v18 = vmov (!%p650_p10), 0.0   ;;  %vm863_vm4 = vmmov (!%p650_p10), 0   ;;  %v864_v22 = vmov (!%p650_p10), 0.0|0.0  }
  0x51   : > { %v297_v3 = vshrl.u32 %v296_v1, 7  ;;  %670 = vmatprep.subr.mxu0 (!%p650_p10), %v862_v18  ;;  %672 = vmatprep.mubr.msk.f32.mxu0 (!%p650_p10), %vm863_vm4, %v862_v18  ;;  %v399_v20 = vld [vmem:[%s1052_s3] sm:$0xff] (!%p650_p10)  ;;  %v400_v21 = vld [vmem:[%s1052_s3 + $0x8] sm:$0xff] (!%p650_p10)  ;;  %v401_v24 = vld [vmem:[%s1052_s3 + $0x10] sm:$0xff] (!%p650_p10)  ;;  %vm404_vm5 = vcmask (!%p650_p10), 261120  }
  0x52   : > { %671 = vmatpush3.msra.mxu0 (!%p650_p10), %v324_v16  ;;  %697 = vmatprep.subr.bf16.mxu1 (!%p650_p10), %v864_v22  ;;  %v698_v23 = vpack.c.bf16 (!%p650_p10), %v400_v21, %v399_v20  ;;  %v402_v25 = vld [vmem:[%s1052_s3 + $0x18] sm:$0xff] (!%p650_p10)  ;;  %v325_v27 = vld [vmem:[%s1051_s2] sm:$0x1] (!%p650_p10)  ;;  %v492_v31 = vld [vmem:[#allocation6] sm:$0xff] (!%p650_p10) }
  0x53   : > { %v300_v4 = vadd.s32 %v299_v2, %v297_v3  ;;  %683 = vmatprep.mubr.msk.f32.mxu1 (!%p650_p10), %vm863_vm4, %v862_v18  ;;  %703 = vmatprep.subr.bf16.mxu0 (!%p650_p10), %v864_v22  ;;  %v701_v26 = vpack.c.bf16 (!%p650_p10), %v402_v25, %v401_v24  ;;  %v493_v32 = vld [vmem:[#allocation6 + $0x8] sm:$0xff] (!%p650_p10)  ;;  %v494_v34 = vld [vmem:[#allocation6 + $0x10] sm:$0xff] (!%p650_p10)  ;;  %v495_v35 = vld [vmem:[#allocation6 + $0x18] sm:$0xff] (!%p650_p10) }
  0x54   : > { %699 = vmatpush3.bf16.msra.mxu1 (!%p650_p10), %v698_v23  ;;  %v704_v33 = vpack.c.bf16 (!%p650_p10), %v493_v32, %v492_v31  ;;  %v707_v36 = vpack.c.bf16 (!%p650_p10), %v495_v35, %v494_v34  ;;  %v403_v37 = vld [vmem:[%s1053_s4] sm:$0x1] (!%p650_p10) }
  0x55   : > { %vm301_vm2 = vcmp.lt.s32.totalorder %v300_v4, 16  ;;  %700 = vmatprep.subr.bf16.mxu1 (!%p650_p10), %v864_v22  ;;  %v496_v53 = vld [vmem:[%s1055_s6] sm:$0x1] (!%p650_p10) }
  0x56   : > { %v305_v6 = vsel %vm301_vm2, %v302_v5, 0.0 }
  0x57   : > { %v308_v7 = vsel %vm307_vm1, %v305_v6, 0.0 }
  0x58   : > { %v309_v8 = vrot.slane %v308_v7, 4  ;;  %702 = vmatpush3.bf16.msra.mxu1 (!%p650_p10), %v701_v26 }
  0x5a   : > { %v310_v9 = vadd.f32 %v309_v8, %v308_v7 }
  0x5c   : > { %v311_v10 = vrot.slane %v310_v9, 2 }
  0x5e   : > { %v312_v11 = vadd.f32 %v311_v10, %v310_v9 }
  0x60   : > { %v313_v12 = vrot.slane %v312_v11, 1  ;;  %321 = sbr.rel (%p650_p10) target bundleno = 787 (0x313), region = 64 }
  0x62   : > { %v314_v14 = vadd.f32 %v313_v12, %v312_v11 }
  0x64   : > { %v315_v15 = vadd.f32 %v314_v14, %v306_v13 }
  0x66   : > { %317 = vst.msk [vmem:[#allocation2] sm:$0x1] %vm316_vm3, %v315_v15 }
  0x6d   : > { %v322_v17 = vld [vmem:[#allocation2] sm:$0x1] }
  0x6e   : > { %v323_v19 = vmul.f32 0.0625, %v322_v17 }
  0x70   : > { %673 = vmatmul.mubr.msk.f32.vlgmr.msra.gmra.mrb[0].mxu0 %vm307_vm1, %v323_v19 }
  0x71   : > { %694 = vmatprep.mubr.msk.f32.mxu0 %vm863_vm4, %v862_v18  ;;  %705 = vmatpush3.bf16.msra.mxu0 %v704_v33 }
  0x72   : > { %706 = vmatprep.subr.bf16.mxu0 %v864_v22 }
  0x75   : > { %708 = vmatpush3.bf16.msra.mxu0 %v707_v36 }
 0x143   : > { %v395_v28 = vpop.f32.mrb[0].mxu0 }
 0x144   : > { %v396_v29 = vadd.f32 %v395_v28, %v325_v27  ;;  %v674_v30 = vpop.f32.mrb[1].mxu0 }
 0x146   : > { %684 = vmatmul.mubr.msk.f32.vlgmr.msra.gmra.mrb[0].mxu1 %vm404_vm5, %v396_v29 }
 0x219   : > { %v474_v38 = vpop.f32.mrb[0].mxu1 }
 0x21a   : > { %v475_v39 = vadd.f32 %v474_v38, %v403_v37  ;;  %v685_v40 = vpop.f32.mrb[1].mxu1 }
 0x21c   : > { %v479_v41 = vmin.f32 %v475_v39, 20.0  ;;  %vm478_vm7 = vcmp.gt.f32.partialorder %v475_v39, 20.0 }
 0x21e   : > { %v480_v42 = vmul.f32 1.442695, %v479_v41 }
 0x220   : > { %751 = vpow2.f32 %v480_v42 }
 0x22a   : > { %v752_v43 = vpop.eup %751 }
 0x22b   : > { %v482_v44 = vadd.f32 1.0, %v752_v43  ;;  %v485_v45 = vmul.f32 -0.5, %v752_v43  ;;  %v488_v47 = vand.u32 2147483647, %v752_v43 }
 0x22d   : > { %753 = vlog2.f32 %v482_v44  ;;  %v486_v46 = vadd.f32 1.0, %v485_v45  ;;  %vm489_vm6 = vcmp.lt.f32.partialorder %v488_v47, 0.0004427343 }
 0x22f   : > { %v487_v50 = vmul.f32 %v752_v43, %v486_v46 }
 0x237   : > { %v754_v48 = vpop.eup %753 }
 0x238   : > { %v484_v49 = vmul.f32 0.6931472, %v754_v48 }
 0x23a   : > { %v490_v51 = vsel %vm489_vm6, %v487_v50, %v484_v49 }
 0x23b   : > { %v491_v52 = vsel %vm478_vm7, %v475_v39, %v490_v51 }
 0x23c   : > { %695 = vmatmul.mubr.msk.f32.vlgmr.msra.gmra.mrb[2].mxu0 %vm404_vm5, %v491_v52 }
 0x30f   : > { %v566_v54 = vpop.f32.mrb[2].mxu0 }
 0x310   : > { %v567_v55 = vadd.f32 %v566_v54, %v496_v53  ;;  %v696_v56 = vpop.f32.mrb[3].mxu0 }
 0x312   : > { %570 = vst [vmem:[#allocation8] sm:$0x1] %v567_v55 }
 0x313 PF: > { %p732_p11 = scmp.eq.s32.totalorder %s912_s25, 1  ;;  %s865_s12 = smov [#allocation8]  }
 0x314   : > { %s578_s8 = sshll.u32 %s865_s12, 4  ;;  %s579_s8 = int_to_ptr.vmem [resolvable:$true] %s578_s8 }
 0x315   : > { %s811_s30 = scalar_lea.vmem %s579_s8, 16  ;;  %s817_s13 = scalar_lea.vmem %s579_s8, 32 }
 0x316   : > { %p812_p12 = scmp.ne.s32.totalorder %s579_s8, %s811_s30  ;;  %p818_p1 = scmp.lt.s32.totalorder %s579_s8, %s579_s8 }
 0x317   : > { %p819_p5 = scmp.lt.s32.totalorder %s817_s13, %s811_s30 }
 0x318   : > { %p813_p13 = pnand %p812_p12, %p732_p11 }
 0x319   : > { %p820_p7 = por %p819_p5, %p818_p1 }
 0x31a   : > { %p814_p0 = pneg %p813_p13 }
 0x31c   : > { %p821_p8 = pnand %p820_p7, %p814_p0 }
 0x31e   : > { %824 = shalt.err (!%p821_p8)
}
 0x31f   : > { %s825_s15 = scalar_lea.hbm %s1056_s7, 16 }
 0x320   : > { %p826_p2 = scmp.ne.s32.totalorder %s1056_s7, %s825_s15  ;;  %p831_p9 = scmp.lt.u32.totalorder %s825_s15, %s1056_s7 }
 0x322   : > { %p827_p3 = pnand %p826_p2, %p732_p11 }
 0x324   : > { %p828_p4 = pneg %p827_p3 }
 0x326   : > { %p833_p6 = pnand %p831_p9, %p828_p4 }
 0x328   : > { %836 = shalt.err (!%p833_p6)
}
 0x329   : > { %718 = dma.vmem_to_hbm [thread:$0]  (%p732_p11), %s579_s8, 16, %s1056_s7, [#allocation5]  }
 0x32a   : > { %850 = dma.done.wait (%p732_p11), [#allocation5], 16  }
 0x32b   : > { %852 = vsyncadd (%p732_p11), [#allocation5], 4294967280 }
 0x32c PF: > { %s20_s24 = sadd.s32 1, %s855_s24  }
 0x32d   : > { %p17_p10 = scmp.ge.s32.totalorder %s20_s24, 4  }
 0x32f   :  { %19 = sbr.rel (!%p17_p10) target bundleno = 3 (0x3), region = 92 }
 0x336   :  { %591 = vsyncpa [#allocation4], 1 }
 0x337   :  { %593 = vsyncpa [#allocation4 + $0x1], 1 }
 0x338   :  { %594 = vsyncpa [#allocation7], 1 }
 0x339   :  { %595 = vsyncpa [#allocation5], 1 }
 0x33a   :  { %597 = vsyncpa [#allocation5 + $0x1], 1 }

</bundles_post_ra>
